<compile_context>
chip_gen: v6e
topology: v6e:2x2x1
jax: 0.10.0
libtpu: 0.0.40
codegen_flags: <defaults>
</compile_context>

<pallas_src>
import functools

import jax
import jax.numpy as jnp
from jax.experimental import pallas as pl
from jax.experimental.pallas import tpu as pltpu


def _round_up(a, b):
    return ((a + b - 1) // b) * b


# ---------------------------------------------------------------------------
# Kernel 1: sum(|y - target|), lane-dense, tiled over rows.
# Output: (num_parts * 8, 128) partial sums; wrapper does the final jnp.sum.
# ---------------------------------------------------------------------------
def _mae_sum_kernel(y_ref, t_ref, o_ref):
    i = pl.program_id(1)

    @pl.when(i == 0)
    def _():
        o_ref[...] = jnp.zeros_like(o_ref)

    tm = y_ref.shape[0]
    d = jnp.abs(y_ref[...].astype(jnp.float32) - t_ref[...].astype(jnp.float32))
    # Sublane-group partial sum: pure VPU adds, no per-tile cross-lane reduce.
    o_ref[...] += jnp.sum(d.reshape(tm // 8, 8, 128), axis=0)


def mae_sum(y, target, *, tile_rows=512, num_parts=2):
    yf = y.reshape(-1).astype(jnp.float32)
    tf = target.reshape(-1).astype(jnp.float32)
    size = yf.shape[0]
    lanes = 128

    rows = pl.cdiv(size, lanes)
    tm = min(tile_rows, _round_up(rows, 8))          # multiple of 8
    inner = pl.cdiv(rows, num_parts * tm)            # inner tiles per partition
    rows_pad = num_parts * inner * tm
    pad = rows_pad * lanes - size

    y2 = jnp.pad(yf, (0, pad)).reshape(rows_pad, lanes)   # zero pad -> |0-0|=0
    t2 = jnp.pad(tf, (0, pad)).reshape(rows_pad, lanes)

    out = pl.pallas_call(
        _mae_sum_kernel,
        out_shape=jax.ShapeDtypeStruct((num_parts * 8, lanes), jnp.float32),
        grid=(num_parts, inner),
        in_specs=[
            pl.BlockSpec((tm, lanes), lambda p, i: (p * inner + i, 0)),
            pl.BlockSpec((tm, lanes), lambda p, i: (p * inner + i, 0)),
        ],
        out_specs=pl.BlockSpec((8, lanes), lambda p, i: (p, 0)),
        compiler_params=pltpu.CompilerParams(
            dimension_semantics=("parallel", "arbitrary"),
            vmem_limit_bytes=64 * 1024 * 1024,
        ),
    )(y2, t2)
    return jnp.sum(out)


# ---------------------------------------------------------------------------
# Kernel 2: in-kernel edge gather + message MLP + sum(|messages|).
#   message(s, r) = relu([s ; r] @ W1 + b1) @ W2 + b2
# W1 is pre-split (W1s, W1r) so the concat never materializes.
# x stays resident in VMEM; the gather is a one-hot matmul on the MXU.
# Output: (num_parts * 8, M) partial sums; wrapper does the final jnp.sum.
# ---------------------------------------------------------------------------
def _message_l1_kernel(ei_ref, x_ref, w1s_ref, w1r_ref, b1_ref, w2_ref, b2_ref,
                       o_ref, *, n_edges):
    p = pl.program_id(0)
    i = pl.program_id(1)
    n_inner = pl.num_programs(1)
    te = ei_ref.shape[0]
    n_nodes = x_ref.shape[0]

    @pl.when(i == 0)
    def _():
        o_ref[...] = jnp.zeros_like(o_ref)

    # Gather s = x[edge_index[0]], r = x[edge_index[1]] via one-hot matmul.
    idx_s = ei_ref[:, 0:1]                                   # [te, 1] int32
    idx_r = ei_ref[:, 1:2]
    node_ids = jax.lax.broadcasted_iota(jnp.int32, (te, n_nodes), 1)
    x = x_ref[...].astype(jnp.float32)
    onehot_s = (idx_s == node_ids).astype(jnp.float32)       # [te, N]
    onehot_r = (idx_r == node_ids).astype(jnp.float32)
    s = jnp.dot(onehot_s, x, preferred_element_type=jnp.float32)   # [te, F]
    r = jnp.dot(onehot_r, x, preferred_element_type=jnp.float32)

    # Message MLP.
    h = (jnp.dot(s, w1s_ref[...], preferred_element_type=jnp.float32)
         + jnp.dot(r, w1r_ref[...], preferred_element_type=jnp.float32)
         + b1_ref[...])
    h = jnp.maximum(h, 0.0)
    msg = jnp.dot(h, w2_ref[...], preferred_element_type=jnp.float32) + b2_ref[...]

    # Mask padded edges (they were padded with index 0, so msg != 0 there).
    base = (p * n_inner + i) * te
    rows = base + jax.lax.broadcasted_iota(jnp.int32, (te, 1), 0)
    valid = (rows < n_edges).astype(jnp.float32)             # [te, 1]
    m_abs = jnp.abs(msg) * valid                             # [te, M]

    m = m_abs.shape[-1]
    o_ref[...] += jnp.sum(m_abs.reshape(te // 8, 8, m), axis=0)


def message_l1_sum(x, edge_index, w1s, w1r, b1, w2, b2, *,
                   tile_edges=256, num_parts=2):
    n_nodes, f = x.shape
    h = w1s.shape[1]
    m = w2.shape[1]
    e = edge_index.shape[1]

    # Edge tile size: multiple of 8; kept moderate because the one-hot gather
    # temporary scales as te * n_nodes * 4 bytes (tunable per generation).
    te = _round_up(min(tile_edges, _round_up(e, 8)), 8)
    inner = pl.cdiv(e, num_parts * te)
    e_pad = num_parts * inner * te

    ei_t = edge_index.T.astype(jnp.int32)                    # [E, 2]
    ei_t = jnp.pad(ei_t, ((0, e_pad - e), (0, 0)))           # pad idx = 0, masked

    kernel = functools.partial(_message_l1_kernel, n_edges=e)

    flops = 2 * e_pad * (2 * n_nodes * f + 2 * f * h + h * m)
    bytes_accessed = 4 * (n_nodes * f + 2 * e_pad + 2 * f * h + h + h * m + m
                          + num_parts * 8 * m)
    out = pl.pallas_call(
        kernel,
        out_shape=jax.ShapeDtypeStruct((num_parts * 8, m), jnp.float32),
        grid=(num_parts, inner),
        in_specs=[
            pl.BlockSpec((te, 2), lambda p, i: (p * inner + i, 0)),
            pl.BlockSpec((n_nodes, f), lambda p, i: (0, 0)),   # resident in VMEM
            pl.BlockSpec((f, h), lambda p, i: (0, 0)),
            pl.BlockSpec((f, h), lambda p, i: (0, 0)),
            pl.BlockSpec((1, h), lambda p, i: (0, 0)),
            pl.BlockSpec((h, m), lambda p, i: (0, 0)),
            pl.BlockSpec((1, m), lambda p, i: (0, 0)),
        ],
        out_specs=pl.BlockSpec((8, m), lambda p, i: (p, 0)),
        compiler_params=pltpu.CompilerParams(
            dimension_semantics=("parallel", "arbitrary"),
            vmem_limit_bytes=64 * 1024 * 1024,
        ),
        cost_estimate=pl.CostEstimate(flops=flops, transcendentals=0,
                                      bytes_accessed=bytes_accessed),
    )(ei_t, x.astype(jnp.float32), w1s, w1r, b1, w2, b2)
    return jnp.sum(out)


# ---------------------------------------------------------------------------
# Module wrapper (same return structure as the PyTorch forward).
# ---------------------------------------------------------------------------
def mae_loss_with_l1_message_reg(x, edge_index, y, target, params, reg_weight=0.01):
    n = y.shape[0]
    base_loss = mae_sum(y, target) / n

    total_loss = base_loss
    aux = {}
    if reg_weight:
        e = edge_index.shape[1]
        l1_reg = message_l1_sum(
            x, edge_index,
            params["w1s"], params["w1r"], params["b1"],
            params["w2"], params["b2"],
        ) / e
        total_loss = total_loss + reg_weight * l1_reg
        aux = {"base_loss": base_loss, "l1_reg": l1_reg}
    return total_loss, aux


# Pure-JAX reference for verification.
def _reference(x, edge_index, y, target, params, reg_weight=0.01):
    n = y.shape[0]
    base_loss = jnp.sum(jnp.abs(y - target)) / n
    s = x[edge_index[0]]
    r = x[edge_index[1]]
    sr = jnp.concatenate([s, r], axis=-1)
    w1 = jnp.concatenate([params["w1s"], params["w1r"]], axis=0)
    h = jnp.maximum(sr @ w1 + params["b1"][0], 0.0)
    msg = h @ params["w2"] + params["b2"][0]
    l1_reg = jnp.sum(jnp.abs(msg)) / msg.shape[0]
    return base_loss + reg_weight * l1_reg, base_loss, l1_reg


if __name__ == "__main__":
    key = jax.random.PRNGKey(0)
    k_x, k_ei, k_y, k_t, k_w1, k_b1, k_w2, k_b2 = jax.random.split(key, 8)

    N, F, E = 16, 8, 24      # nodes, node-feature dim, edges
    H, M = 32, 8             # message-MLP hidden dim, message dim
    DY = 2                   # target feature dim

    x = jax.random.normal(k_x, (N, F), dtype=jnp.float32)
    edge_index = jax.random.randint(k_ei, (2, E), 0, N, dtype=jnp.int32)
    y = jax.random.normal(k_y, (N, DY), dtype=jnp.float32)
    target = jax.random.normal(k_t, (N, DY), dtype=jnp.float32)

    # Deterministic synthetic weights for model.message: MLP(2F -> H -> M).
    w1 = jax.random.normal(k_w1, (2 * F, H), dtype=jnp.float32) * 0.1
    params = {
        "w1s": w1[:F],
        "w1r": w1[F:],
        "b1": jax.random.normal(k_b1, (1, H), dtype=jnp.float32) * 0.1,
        "w2": jax.random.normal(k_w2, (H, M), dtype=jnp.float32) * 0.1,
        "b2": jax.random.normal(k_b2, (1, M), dtype=jnp.float32) * 0.1,
    }

    total, aux = mae_loss_with_l1_message_reg(
        x, edge_index, y, target, params, reg_weight=0.01
    )
    total = jax.block_until_ready(total)

    ref_total, ref_base, ref_l1 = _reference(
        x, edge_index, y, target, params, reg_weight=0.01
    )
    assert jnp.allclose(total, ref_total, rtol=1e-5, atol=1e-5)
    assert jnp.allclose(aux["base_loss"], ref_base, rtol=1e-5, atol=1e-5)
    assert jnp.allclose(aux["l1_reg"], ref_l1, rtol=1e-5, atol=1e-5)

    print("KERNEL_OK")
</pallas_src>

<mosaic_0001>
module attributes {stable_mosaic.version = 11 : i64} {
  func.func @_mae_sum_kernel(%arg0: i32, %arg1: i32, %arg2: memref<8x128xf32, #tpu.memory_space<vmem>>, %arg3: memref<8x128xf32, #tpu.memory_space<vmem>>, %arg4: memref<8x128xf32, #tpu.memory_space<vmem>>) attributes {dimension_semantics = [#tpu.dimension_semantics<parallel>, #tpu.dimension_semantics<arbitrary>], iteration_bounds = array<i64: 2, 1>, scalar_prefetch = 0 : i64, scratch_operands = 0 : i64, tpu.core_type = #tpu.core_type<tc>, window_params = [{transform_indices = @transform_0, window_bounds = array<i64: 8, 128>}, {transform_indices = @transform_1, window_bounds = array<i64: 8, 128>}, {transform_indices = @transform_2, window_bounds = array<i64: 8, 128>}]} {
    %c0_i32 = arith.constant 0 : i32
    %0 = arith.cmpi eq, %arg1, %c0_i32 : i32
    %1 = arith.extui %0 : i1 to i32
    %c0_i32_0 = arith.constant 0 : i32
    %2 = arith.cmpi ne, %1, %c0_i32_0 : i32
    scf.if %2 {
      %cst_8 = arith.constant 0.000000e+00 : f32
      %12 = vector.broadcast %cst_8 : f32 to vector<8x128xf32>
      %c0_9 = arith.constant 0 : index
      %c0_10 = arith.constant 0 : index
      %13 = vector.load %arg4[%c0_9, %c0_10] : memref<8x128xf32, #tpu.memory_space<vmem>>, vector<8x128xf32>
      tpu.vector_store %arg4[%c0_9, %c0_10], %12 {strides = array<i32>} : memref<8x128xf32, #tpu.memory_space<vmem>>, vector<8x128xf32>,
    } else {
    }
    %c0 = arith.constant 0 : index
    %c0_1 = arith.constant 0 : index
    %3 = vector.load %arg2[%c0, %c0_1] : memref<8x128xf32, #tpu.memory_space<vmem>>, vector<8x128xf32>
    %c0_2 = arith.constant 0 : index
    %c0_3 = arith.constant 0 : index
    %4 = vector.load %arg3[%c0_2, %c0_3] : memref<8x128xf32, #tpu.memory_space<vmem>>, vector<8x128xf32>
    %5 = arith.subf %3, %4 : vector<8x128xf32>
    %6 = math.absf %5 : vector<8x128xf32>
    %c0_4 = arith.constant 0 : index
    %c0_5 = arith.constant 0 : index
    %7 = vector.load %arg4[%c0_4, %c0_5] : memref<8x128xf32, #tpu.memory_space<vmem>>, vector<8x128xf32>
    %8 = vector.shape_cast %6 : vector<8x128xf32> to vector<1x8x128xf32>
    %cst = arith.constant dense<0.000000e+00> : vector<8x128xf32>
    %9 = vector.multi_reduction <add>, %8, %cst [0] : vector<1x8x128xf32> to vector<8x128xf32>
    %10 = arith.addf %7, %9 : vector<8x128xf32>
    %c0_6 = arith.constant 0 : index
    %c0_7 = arith.constant 0 : index
    %11 = vector.load %arg4[%c0_6, %c0_7] : memref<8x128xf32, #tpu.memory_space<vmem>>, vector<8x128xf32>
    tpu.vector_store %arg4[%c0_6, %c0_7], %10 {strides = array<i32>} : memref<8x128xf32, #tpu.memory_space<vmem>>, vector<8x128xf32>,
    return
  }
  func.func @transform_0(%arg0: i32, %arg1: i32) -> (i32, i32) {
    %c1_i32 = arith.constant 1 : i32
    %0 = arith.muli %arg0, %c1_i32 : i32
    %1 = arith.addi %0, %arg1 : i32
    %c0_i32 = arith.constant 0 : i32
    %c0_i32_0 = arith.constant 0 : i32
    return %1, %c0_i32 : i32, i32
  }
  func.func @transform_1(%arg0: i32, %arg1: i32) -> (i32, i32) {
    %c1_i32 = arith.constant 1 : i32
    %0 = arith.muli %arg0, %c1_i32 : i32
    %1 = arith.addi %0, %arg1 : i32
    %c0_i32 = arith.constant 0 : i32
    %c0_i32_0 = arith.constant 0 : i32
    return %1, %c0_i32 : i32, i32
  }
  func.func @transform_2(%arg0: i32, %arg1: i32) -> (i32, i32) {
    %c0_i32 = arith.constant 0 : i32
    %c0_i32_0 = arith.constant 0 : i32
    return %arg0, %c0_i32 : i32, i32
  }
}

</mosaic_0001>

<bundles_post_ra>
// kernel: tpu_custom_call.1
= control target key start
LH: loop header
LB: loop body
LE: loop exit
PB: predicated region body
PF: predicated region fallthrough
CT: control target
= control target key end

     0   :  { %7 = vsyncpa [#allocation3], 0  ;;  %s751_s0 = inlined_call_operand.hbm [shape: f32[16,128], index: 0, kind: input, shape index: {}]   ;;  %s752_s1 = inlined_call_operand.hbm [shape: f32[16,128], index: 1, kind: input, shape index: {}]   ;;  %s753_s2 = inlined_call_operand.hbm [shape: f32[16,128], index: 2, kind: output, shape index: {}]  }
   0x1   :  { %9 = vsyncpa [#allocation3 + $0x1], 0 }
   0x2   :  { %10 = vsyncpa [#allocation6], 0 }
   0x3   :  { %12 = vsyncpa [#allocation6 + $0x1], 0 }
   0x4   :  { %13 = vsyncpa [#allocation4], 0 }
   0x5   :  { %15 = vsyncpa [#allocation4 + $0x1], 0  ;;  %s590_s9 = smov 0   ;;  %s592_s10 = smov 0  }
   0x6   :  { %s594_s11 = smov 0   ;;  %s596_s12 = smov 0  }
   0x7   :  { %s598_s13 = smov 0   ;;  %s600_s14 = smov 0  }
   0x8 LB: > { %s346_s15 = sadd.s32 4294967295, %s570_s14   ;;  %s347_s16 = sadd.s32 4294967294, %s570_s14   ;;  %s570_s14 = sphi %s600_s14, %s21_s14   ;;  %s566_s13 = sphi %s598_s13, %s765_s13   ;;  %s562_s12 = sphi %s596_s12, %s764_s12   ;;  %s558_s11 = sphi %s594_s11, %s763_s11   ;;  %s554_s10 = sphi %s592_s10, %s762_s10   ;;  %s550_s9 = sphi %s590_s9, %s761_s9  }
   0x9   : > { %s33_s17 = sadd.s32 1, %s566_s13  ;;  %s42_s18 = sadd.s32 1, %s558_s11 }
   0xa   : > { %p35_p0 = scmp.ge.s32.totalorder %s33_s17, 2  ;;  %p49_p1 = scmp.ne.s32.totalorder %s558_s11, %s554_s10 }
   0xb   : > { %p50_p2 = scmp.eq.s32.totalorder %s570_s14, 0  ;;  %p55_p3 = scmp.ne.s32.totalorder %s554_s10, %s550_s9 }
   0xc   : > { %s767_s17 = smov (%p35_p0, %s33_s17), 0  ;;  %p56_p5 = scmp.eq.s32.totalorder %s346_s15, 0 }
   0xd   : > { %p631_p4 = por %p50_p2, %p49_p1  ;;  %s39_s20 = ssub.s32 %s566_s13, %s767_s17 }
   0xe   : > { %p107_p6 = scmp.eq.s32.totalorder %s346_s15, 1  ;;  %p40_p7 = scmp.eq.s32.totalorder %s39_s20, 0 }
   0xf   : > { %p637_p8 = por %p56_p5, %p55_p3  ;;  %p113_p10 = scmp.eq.s32.totalorder %s347_s16, 1 }
  0x10   : > { %p641_p9 = por %p107_p6, %p49_p1  ;;  %p379_p13 = scmp.lt.s32.totalorder %s570_s14, 2 }
  0x11   : > { %s646_s23 = scalar_select %p40_p7, %s558_s11, %s42_s18  }
  0x12   : > { %p648_p11 = por %p113_p10, %p55_p3  ;;  %s655_s25 = sand.u32 1, %s558_s11  }
  0x13   : > { %s350_s26 = sshll.u32 %s655_s25, 3  ;;  %s351_s27 = sshll.u32 %s566_s13, 7 }
  0x14   : > { %s143_s30 = scalar_lea.hbm %s751_s0, %s351_s27  ;;  %s137_s3 = scalar_lea.vmem [#allocation2], %s350_s26 }
  0x15   : > { %s145_s4 = sshll.u32 %s137_s3, 4  ;;  %p664_p0 = pnand %p379_p13, %p631_p4  ;;  %s146_s4 = int_to_ptr.vmem [resolvable:$true] %s145_s4 }
  0x16   : > { %p354_p1 = scmp.ge.s32.totalorder %s570_s14, 1  ;;  %p169_p2 = scmp.lt.s32.totalorder %s570_s14, 3 }
  0x17   : > { %s134_s6 = scalar_lea.sflag [#allocation3], %s655_s25  ;;  %p432_p3 = pneg %p664_p0 }
  0x18   : > { %s443_s7 = scalar_lea.vmem %s146_s4, 128  ;;  %s572_s8 = smov [#allocation2]  }
  0x19   : > { %p444_p5 = scmp.ne.s32.totalorder %s146_s4, %s443_s7  ;;  %s448_s15 = sshll.u32 %s572_s8, 4  ;;  %s449_s15 = int_to_ptr.vmem [resolvable:$false] %s448_s15 }
  0x1a   : > { %s450_s16 = scalar_lea.vmem %s449_s15, 256  ;;  %p451_p4 = scmp.lt.s32.totalorder %s146_s4, %s449_s15 }
  0x1b   : > { %p446_p6 = pnand %p444_p5, %p432_p3  ;;  %p452_p10 = scmp.lt.s32.totalorder %s450_s16, %s443_s7 }
  0x1d   : > { %p447_p7 = pneg %p446_p6  ;;  %p453_p13 = por %p452_p10, %p451_p4 }
  0x1f   : > { %p454_p12 = pnand %p453_p13, %p447_p7 }
  0x21   : > { %457 = shalt.err (!%p454_p12)
}
  0x22   : > { %371 = dma.hbm_to_vmem [thread:$0]  (!%p664_p0), %s143_s30, 128, %s146_s4, %s134_s6  }
  0x23   : > { %p682_p5 = pnand %p354_p1, %p169_p2  ;;  %s162_s28 = scalar_lea.hbm %s752_s1, %s351_s27 }
  0x24   : > { %s156_s29 = scalar_lea.vmem [#allocation5], %s350_s26  ;;  %s153_s7 = scalar_lea.sflag [#allocation6], %s655_s25 }
  0x25   : > { %s164_s3 = sshll.u32 %s156_s29, 4  ;;  %s573_s30 = smov [#allocation5]   ;;  %s165_s3 = int_to_ptr.vmem [resolvable:$true] %s164_s3 }
  0x26   : > { %s471_s8 = scalar_lea.vmem %s165_s3, 128  ;;  %s476_s4 = sshll.u32 %s573_s30, 4  ;;  %s477_s4 = int_to_ptr.vmem [resolvable:$false] %s476_s4 }
  0x27   : > { %p472_p12 = scmp.ne.s32.totalorder %s165_s3, %s471_s8  ;;  %s478_s6 = scalar_lea.vmem %s477_s4, 256 }
  0x28   : > { %p479_p1 = scmp.lt.s32.totalorder %s165_s3, %s477_s4  ;;  %p480_p2 = scmp.lt.s32.totalorder %s478_s6, %s471_s8 }
  0x29   : > { %p474_p6 = pnand %p472_p12, %p432_p3 }
  0x2a   : > { %p481_p4 = por %p480_p2, %p479_p1 }
  0x2b   : > { %p475_p7 = pneg %p474_p6 }
  0x2d   : > { %p482_p10 = pnand %p481_p4, %p475_p7 }
  0x2f   : > { %485 = shalt.err (!%p482_p10)
}
  0x30   : > { %374 = dma.hbm_to_vmem [thread:$0]  (!%p664_p0), %s162_s28, 128, %s165_s3, %s153_s7  }
  0x31   : > { %173 = sbr.rel (%p682_p5) target bundleno = 81 (0x51), region = 28  ;;  %s698_s25 = sand.u32 (!%p682_p5), 1, %s554_s10  }
  0x32   : > { %s355_s26 = sshll.u32 (!%p682_p5), %s698_s25, 3  ;;  %s176_s27 = scalar_lea.sflag (!%p682_p5), [#allocation3], %s698_s25 }
  0x33   : > { %s179_s15 = scalar_lea.vmem (!%p682_p5), [#allocation2], %s355_s26 }
  0x36   : > { %537 = dma.done.wait (%p637_p8), %s176_s27, 128  }
  0x37   : > { %539 = vsyncadd (%p637_p8), %s176_s27, 4294967168  ;;  %s185_s5 = scalar_lea.sflag [#allocation6], %s698_s25  ;;  %s188_s16 = scalar_lea.vmem [#allocation5], %s355_s26 }
  0x38   : > { %541 = dma.done.wait (%p637_p8), %s185_s5, 128  }
  0x39   : > { %543 = vsyncadd (%p637_p8), %s185_s5, 4294967168  ;;  %v221_v0 = vld [vmem:[%s179_s15] sm:$0xff]  ;;  %v222_v1 = vld [vmem:[%s188_s16] sm:$0xff]  ;;  %s359_s18 = sshll.u32 %s562_s12, 7  ;;  %s213_s19 = scalar_lea.vmem [#allocation7], %s355_s26 }
  0x3a   : > { %v223_v2 = vsub.f32 %v221_v0, %v222_v1  ;;  %s243_s20 = sshll.u32 %s213_s19, 4  ;;  %s241_s3 = scalar_lea.hbm %s753_s2, %s359_s18  ;;  %s244_s20 = int_to_ptr.vmem [resolvable:$true] %s243_s20 }
  0x3b   : > { %s230_s7 = scalar_lea.sflag [#allocation4], %s698_s25  ;;  %s486_s8 = scalar_lea.vmem %s244_s20, 128 }
  0x3c   : > { %v224_v3 = vand.u32 2147483647, %v223_v2  ;;  %p487_p0 = scmp.ne.s32.totalorder %s244_s20, %s486_s8  ;;  %s574_s21 = smov [#allocation7]  }
  0x3d   : > { %s490_s30 = sshll.u32 %s574_s21, 4  ;;  %s491_s30 = int_to_ptr.vmem [resolvable:$false] %s490_s30 }
  0x3e   : > { %228 = vst [vmem:[%s213_s19] sm:$0xff] %v224_v3  ;;  %p488_p8 = pnand %p487_p0, %p641_p9  ;;  %s492_s4 = scalar_lea.vmem %s491_s30, 256 }
  0x3f   : > { %p493_p13 = scmp.lt.s32.totalorder %s244_s20, %s491_s30  ;;  %p494_p5 = scmp.lt.s32.totalorder %s492_s4, %s486_s8 }
  0x40   : > { %p489_p3 = pneg %p488_p8 }
  0x41   : > { %p495_p12 = por %p494_p5, %p493_p13 }
  0x43   : > { %p496_p6 = pnand %p495_p12, %p489_p3 }
  0x45   : > { %499 = shalt.err (!%p496_p6)
}
  0x46   : > { %s500_s12 = scalar_lea.hbm %s241_s3, 128  ;;  %s504_s26 = scalar_lea.hbm %s753_s2, 256 }
  0x47   : > { %p501_p7 = scmp.ne.s32.totalorder %s241_s3, %s500_s12  ;;  %p505_p4 = scmp.lt.s32.totalorder %s241_s3, %s753_s2 }
  0x48   : > { %p506_p10 = scmp.lt.s32.totalorder %s504_s26, %s500_s12 }
  0x49   : > { %p502_p1 = pnand %p501_p7, %p641_p9 }
  0x4a   : > { %p507_p0 = por %p506_p10, %p505_p4 }
  0x4b   : > { %p503_p2 = pneg %p502_p1 }
  0x4d   : > { %p508_p8 = pnand %p507_p0, %p503_p2 }
  0x4f   : > { %511 = shalt.err (!%p508_p8)
}
  0x50   : > { %366 = dma.vmem_to_hbm [thread:$0]  (%p641_p9), %s244_s20, 128, %s241_s3, %s230_s7  }
  0x51 PF: > { %s255_s5 = sand.u32 1, %s550_s9   ;;  %p760_p3 = scmp.ge.s32.totalorder %s570_s14, 2 }
  0x52   : > { %s256_s16 = scalar_lea.sflag [#allocation4], %s255_s5 }
  0x53   : > { %p376_p13 = pnand %p760_p3, %p648_p11 }
  0x55   : > { %p377_p5 = pneg %p376_p13 }
  0x57   : > { %545 = dma.done.wait (%p377_p5), %s256_s16, 128  }
  0x58   : > { %547 = vsyncadd (%p377_p5), %s256_s16, 4294967168  ;;  %s21_s14 = sadd.s32 1, %s570_s14   ;;  %s761_s9 = smov %s554_s10 }
  0x59   : > { %p18_p12 = scmp.ge.s32.totalorder %s21_s14, 4   ;;  %s762_s10 = smov %s558_s11 }
  0x5a   : > { %s763_s11 = smov %s646_s23  ;;  %s764_s12 = smov %s566_s13 }
  0x5b   : > { %s765_s13 = smov %s767_s17  ;;  %20 = sbr.rel (!%p18_p12) target bundleno = 8 (0x8), region = 90 }
  0x60   :  { %261 = vsyncpa [#allocation3], 1 }
  0x61   :  { %263 = vsyncpa [#allocation3 + $0x1], 1 }
  0x62   :  { %264 = vsyncpa [#allocation6], 1 }
  0x63   :  { %266 = vsyncpa [#allocation6 + $0x1], 1 }
  0x64   :  { %267 = vsyncpa [#allocation4], 1 }
  0x65   :  { %269 = vsyncpa [#allocation4 + $0x1], 1 }

</bundles_post_ra>
